<compile_context>
chip_gen: v6e
topology: v6e:2x2x1
jax: 0.10.0
libtpu: 0.0.40
codegen_flags: <defaults>
</compile_context>

<pallas_src>
import jax
import jax.numpy as jnp
from jax.experimental import pallas as pl
from jax.experimental.pallas import tpu as pltpu

N_CLASSES = 10


def _pl_kernel(params_ref, y_ref, thpc_ref, mask_ref, b_ref, x_ref, w_ref,
               loss_ref, cfreq_ref, acc_ref):
    k = pl.program_id(0)

    @pl.when(k == 0)
    def _init():
        acc_ref[...] = jnp.zeros_like(acc_ref)

    # MXU hot path: bf16 operands, f32 accumulation, K tiled over the grid.
    acc_ref[...] += jnp.dot(x_ref[...], w_ref[...],
                            preferred_element_type=jnp.float32)

    @pl.when(k == pl.num_programs(0) - 1)
    def _finalize():
        # params (SMEM): [th, min_th, lambda_decay, prev_max_conf, prev_conf]
        th      = params_ref[0]
        min_th  = params_ref[1]
        lam     = params_ref[2]
        prev_mc = params_ref[3]
        prev_c  = params_ref[4]

        y = y_ref[...]                                   # [B, C] f32 logits
        B, C = y.shape
        col = jax.lax.broadcasted_iota(jnp.int32, (B, C), 1)

        # softmax(y, dim=1); reciprocal on the EUP
        row_max = jnp.max(y, axis=1, keepdims=True)
        e = jnp.exp(y - row_max)
        y_probs = e * pl.reciprocal(jnp.sum(e, axis=1, keepdims=True),
                                    approx=True)
        # first-occurrence argmax on y itself (softmax is monotone => same
        # index as argmax(y_probs)); f32 compare against the same row max.
        argmax_idx = jnp.min(jnp.where(y == row_max, col, C),
                             axis=1, keepdims=True)      # [B, 1] int32

        # max_confidence = y_probs.mean(dim=1)[0].mean()  (== 1/C; kept for parity)
        max_conf = jnp.mean(y_probs[0:1, :], keepdims=True)      # [1, 1]
        # confidence = y_probs.mean(dim=0)
        conf = jnp.mean(y_probs, axis=0, keepdims=True)          # [1, C]

        # global-threshold update
        max_ind = (th > min_th).astype(jnp.float32)
        delta_mc = jnp.maximum(max_conf - prev_mc, 0.0) * max_ind
        th_new = th - (1.0 - lam) * delta_mc                     # [1, 1]

        # per-class threshold update (indicator uses the *old* thpc, like the module)
        thpc = thpc_ref[...]                                     # [1, C]
        ind = (thpc > min_th).astype(jnp.float32)
        delta_c = jnp.maximum(conf - prev_c, 0.0) * ind
        thpc = thpc - (1.0 - lam) * delta_c
        # harmonic mean with the updated global threshold (EUP reciprocal)
        thpc = (2.0 * thpc * th_new) * pl.reciprocal(thpc + th_new, approx=True)
        # TODO(synk): the module appends th_per_class to class_thresholds.csv and
        #             mutates self.th / self.confidence / self.iter_count; file I/O
        #             and persistent Python-side state are host side effects with no
        #             in-kernel equivalent.

        # gt_mask, gt_mask_idxs = (y_probs > th_per_class).float().max(1)
        gt_full = (y_probs > thpc).astype(jnp.float32)           # [B, C]
        gt_mask = jnp.max(gt_full, axis=1, keepdims=True)        # [B, 1]
        gt_idx = jnp.min(jnp.where(gt_full == gt_mask, col, C),
                         axis=1, keepdims=True)                  # [B, 1]; all-zero row -> 0

        # class_freq[i] += 1 for each selected index  ->  sum of one-hots
        cfreq_ref[...] = jnp.sum((col == gt_idx).astype(jnp.float32),
                                 axis=0, keepdims=True)          # [1, C]

        # p_target = gt*10*onehot + (1-gt)*y_probs ; one-hot fused into the where.
        # (10.0 is the literal constant from the PyTorch module, not n_classes.)
        lt_part = (1.0 - gt_mask) * y_probs                      # [B, C]
        p_target = jnp.where(col == argmax_idx, gt_mask * 10.0 + lt_part, lt_part)

        # log_softmax(output, 1) on the accumulated linear-head logits
        out = acc_ref[...] + b_ref[...]                          # [B, C] f32
        out_shift = out - jnp.max(out, axis=1, keepdims=True)
        logp = out_shift - jnp.log(jnp.sum(jnp.exp(out_shift), axis=1,
                                           keepdims=True))

        # loss = (-(p_target * logp).sum(1) * mask).mean()
        per = -jnp.sum(p_target * logp, axis=1, keepdims=True) * mask_ref[...]
        loss_ref[...] = jnp.sum(per, axis=(0, 1), keepdims=True) * (1.0 / B)


def pl_forward(x, y, mask, w, b, *, th, th_per_class,
               lambda_decay=0.999, min_th=0.8,
               prev_confidence=0.0, prev_max_confidence=0.0,
               max_tk=2048):
    """Returns (loss, class_freq) exactly like PL.forward."""
    B = x.shape[0]
    C = N_CLASSES

    # bf16 matmul operands (halved DMA bytes, 2x MXU rate); everything else f32.
    x_flat = x.reshape(B, -1).astype(jnp.bfloat16)      # NCHW flatten, row-major
    w_kd = jnp.asarray(w, jnp.bfloat16)                 # [D, C], K-major
    D = x_flat.shape[1]

    y = jnp.asarray(y, jnp.float32)
    thpc = th_per_class.reshape(1, C).astype(jnp.float32)
    mask2 = mask.reshape(B, 1).astype(jnp.float32)
    b2 = b.reshape(1, C).astype(jnp.float32)
    params = jnp.array([th, min_th, lambda_decay,
                        prev_max_confidence, prev_confidence], dtype=jnp.float32)

    # K-axis tiling: one block if D is small, otherwise 128-aligned tiles
    # (zero-pad K; padded rows contribute 0 to the matmul).
    if D <= max_tk:
        tk, Dp = D, D
    else:
        tk = (max_tk // 128) * 128
        Dp = ((D + tk - 1) // tk) * tk
        if Dp != D:
            x_flat = jnp.pad(x_flat, ((0, 0), (0, Dp - D)))
            w_kd = jnp.pad(w_kd, ((0, Dp - D), (0, 0)))
    nk = Dp // tk

    # Scheduling hints: cost estimate + a VMEM limit sized from the real buffers.
    flops = 2 * B * D * C + 40 * B * C
    transcendentals = 2 * B * C + B
    bytes_accessed = (B * Dp + Dp * C) * 2 + (B * C + 4 * C + B + 5) * 4
    cost = pl.CostEstimate(flops=flops, transcendentals=transcendentals,
                           bytes_accessed=bytes_accessed)

    tile_bytes = 2 * (B * tk + tk * 128) * 2            # double-buffered bf16 x & (lane-padded) w tiles
    small_bytes = (6 * max(B, 8) * 128 + 8 * 128) * 4   # resident y/mask/acc + thpc/b/cfreq/loss
    vmem_limit = int(max(8 << 20, min(48 << 20, 4 * (tile_bytes + small_bytes))))

    smem = pl.BlockSpec(memory_space=pltpu.MemorySpace.SMEM)

    loss, cfreq = pl.pallas_call(
        _pl_kernel,
        out_shape=(jax.ShapeDtypeStruct((1, 1), jnp.float32),
                   jax.ShapeDtypeStruct((1, C), jnp.float32)),
        grid=(nk,),
        in_specs=[
            smem,                                        # params (SMEM scalars)
            pl.BlockSpec((B, C), lambda k: (0, 0)),      # y       (resident)
            pl.BlockSpec((1, C), lambda k: (0, 0)),      # th_per_class
            pl.BlockSpec((B, 1), lambda k: (0, 0)),      # mask
            pl.BlockSpec((1, C), lambda k: (0, 0)),      # bias
            pl.BlockSpec((B, tk), lambda k: (0, k)),     # x tile  (bf16)
            pl.BlockSpec((tk, C), lambda k: (k, 0)),     # w tile  (bf16)
        ],
        out_specs=(pl.BlockSpec((1, 1), lambda k: (0, 0)),
                   pl.BlockSpec((1, C), lambda k: (0, 0))),
        scratch_shapes=[pltpu.VMEM((B, C), jnp.float32)],   # f32 accumulator
        compiler_params=pltpu.CompilerParams(
            dimension_semantics=("arbitrary",),          # K is a reduction axis
            vmem_limit_bytes=vmem_limit),
        cost_estimate=cost,
    )(params, y, thpc, mask2, b2, x_flat, w_kd)

    return loss[0, 0], cfreq[0]


if __name__ == "__main__":
    key = jax.random.PRNGKey(0)
    kx, ky, kw, kf = jax.random.split(key, 4)

    B, C_in, H, W = 2, 4, 16, 16
    D = C_in * H * W

    x = jax.random.normal(kx, (B, C_in, H, W), dtype=jnp.float32)
    y = jax.random.normal(ky, (B, N_CLASSES), dtype=jnp.float32)
    mask = jnp.ones((B,), dtype=jnp.float32)

    # deterministic "model": linear classifier weights
    w = jax.random.normal(kw, (D, N_CLASSES), dtype=jnp.float32) * 0.02
    b = jnp.zeros((N_CLASSES,), dtype=jnp.float32)

    # PL.__init__ with freq_per_class provided:
    #   th_per_class = minmax(freq) * (max_th - min_th) + min_th
    min_th, max_th = 0.8, 0.95
    freq_per_class = jax.random.uniform(kf, (N_CLASSES,), dtype=jnp.float32)
    fpc = (freq_per_class - freq_per_class.min()) / (freq_per_class.max() - freq_per_class.min())
    th_per_class = fpc * (max_th - min_th) + min_th

    loss, class_freq = pl_forward(
        x, y, mask, w, b,
        th=0.9, th_per_class=th_per_class,
        lambda_decay=0.999, min_th=min_th,
        prev_confidence=0.0, prev_max_confidence=0.0,
    )
    jax.block_until_ready((loss, class_freq))
    print("KERNEL_OK")
</pallas_src>

<mosaic_0001>
module attributes {stable_mosaic.version = 11 : i64} {
  func.func @_pl_kernel(%arg0: i32, %arg1: memref<5xf32, #tpu.memory_space<smem>>, %arg2: memref<2x10xf32, #tpu.memory_space<vmem>>, %arg3: memref<1x10xf32, #tpu.memory_space<vmem>>, %arg4: memref<2x1xf32, #tpu.memory_space<vmem>>, %arg5: memref<1x10xf32, #tpu.memory_space<vmem>>, %arg6: memref<2x1024xbf16, #tpu.memory_space<vmem>>, %arg7: memref<1024x10xbf16, #tpu.memory_space<vmem>>, %arg8: memref<1x1xf32, #tpu.memory_space<vmem>>, %arg9: memref<1x10xf32, #tpu.memory_space<vmem>>, %arg10: memref<2x10xf32, #tpu.memory_space<vmem>>) attributes {dimension_semantics = [#tpu.dimension_semantics<arbitrary>], iteration_bounds = array<i64: 1>, scalar_prefetch = 0 : i64, scratch_operands = 1 : i64, tpu.core_type = #tpu.core_type<tc>, window_params = [{transform_indices = @transform_0, window_bounds = array<i64: 5>}, {pipeline_mode = #tpu.pipeline_mode<synchronous>, transform_indices = @transform_1, window_bounds = array<i64: 2, 10>}, {pipeline_mode = #tpu.pipeline_mode<synchronous>, transform_indices = @transform_2, window_bounds = array<i64: 1, 10>}, {pipeline_mode = #tpu.pipeline_mode<synchronous>, transform_indices = @transform_3, window_bounds = array<i64: 2, 1>}, {pipeline_mode = #tpu.pipeline_mode<synchronous>, transform_indices = @transform_4, window_bounds = array<i64: 1, 10>}, {transform_indices = @transform_5, window_bounds = array<i64: 2, 1024>}, {transform_indices = @transform_6, window_bounds = array<i64: 1024, 10>}, {pipeline_mode = #tpu.pipeline_mode<synchronous>, transform_indices = @transform_7, window_bounds = array<i64: 1, 1>}, {pipeline_mode = #tpu.pipeline_mode<synchronous>, transform_indices = @transform_8, window_bounds = array<i64: 1, 10>}]} {
    %c0_i32 = arith.constant 0 : i32
    %0 = arith.cmpi eq, %arg0, %c0_i32 : i32
    %1 = arith.extui %0 : i1 to i32
    %c0_i32_0 = arith.constant 0 : i32
    %2 = arith.cmpi ne, %1, %c0_i32_0 : i32
    scf.if %2 {
      %cst_10 = arith.constant 0.000000e+00 : f32
      %12 = vector.broadcast %cst_10 : f32 to vector<2x10xf32>
      %c0_11 = arith.constant 0 : index
      %c0_12 = arith.constant 0 : index
      %13 = vector.load %arg10[%c0_11, %c0_12] : memref<2x10xf32, #tpu.memory_space<vmem>>, vector<2x10xf32>
      tpu.vector_store %arg10[%c0_11, %c0_12], %12 {strides = array<i32>} : memref<2x10xf32, #tpu.memory_space<vmem>>, vector<2x10xf32>,
    } else {
    }
    %c0 = arith.constant 0 : index
    %c0_1 = arith.constant 0 : index
    %3 = vector.load %arg10[%c0, %c0_1] : memref<2x10xf32, #tpu.memory_space<vmem>>, vector<2x10xf32>
    %c0_2 = arith.constant 0 : index
    %c0_3 = arith.constant 0 : index
    %4 = vector.load %arg6[%c0_2, %c0_3] : memref<2x1024xbf16, #tpu.memory_space<vmem>>, vector<2x1024xbf16>
    %c0_4 = arith.constant 0 : index
    %c0_5 = arith.constant 0 : index
    %5 = vector.load %arg7[%c0_4, %c0_5] : memref<1024x10xbf16, #tpu.memory_space<vmem>>, vector<1024x10xbf16>
    %cst = arith.constant dense<0.000000e+00> : vector<2x10xf32>
    %6 = tpu.matmul %4, %5, %cst {dimension_numbers = #tpu.dot_dimension_numbers<[1], [0], [0], [1], [0, 0, 1, 1], [], []>} : vector<2x1024xbf16>, vector<1024x10xbf16>, vector<2x10xf32> -> vector<2x10xf32>
    %7 = arith.addf %3, %6 : vector<2x10xf32>
    %c0_6 = arith.constant 0 : index
    %c0_7 = arith.constant 0 : index
    %8 = vector.load %arg10[%c0_6, %c0_7] : memref<2x10xf32, #tpu.memory_space<vmem>>, vector<2x10xf32>
    tpu.vector_store %arg10[%c0_6, %c0_7], %7 {strides = array<i32>} : memref<2x10xf32, #tpu.memory_space<vmem>>, vector<2x10xf32>,
    %c0_i32_8 = arith.constant 0 : i32
    %9 = arith.cmpi eq, %arg0, %c0_i32_8 : i32
    %10 = arith.extui %9 : i1 to i32
    %c0_i32_9 = arith.constant 0 : i32
    %11 = arith.cmpi ne, %10, %c0_i32_9 : i32
    scf.if %11 {
      %c0_10 = arith.constant 0 : index
      %12 = memref.load %arg1[%c0_10] : memref<5xf32, #tpu.memory_space<smem>>
      %c1 = arith.constant 1 : index
      %13 = memref.load %arg1[%c1] : memref<5xf32, #tpu.memory_space<smem>>
      %c2 = arith.constant 2 : index
      %14 = memref.load %arg1[%c2] : memref<5xf32, #tpu.memory_space<smem>>
      %c3 = arith.constant 3 : index
      %15 = memref.load %arg1[%c3] : memref<5xf32, #tpu.memory_space<smem>>
      %c4 = arith.constant 4 : index
      %16 = memref.load %arg1[%c4] : memref<5xf32, #tpu.memory_space<smem>>
      %c0_11 = arith.constant 0 : index
      %c0_12 = arith.constant 0 : index
      %17 = vector.load %arg2[%c0_11, %c0_12] : memref<2x10xf32, #tpu.memory_space<vmem>>, vector<2x10xf32>
      %18 = tpu.iota {dimensions = array<i32: 1>} : vector<2x10xi32>
      %cst_13 = arith.constant dense<0xFF800000> : vector<2xf32>
      %19 = vector.multi_reduction <maximumf>, %17, %cst_13 [1] : vector<2x10xf32> to vector<2xf32>
      %20 = vector.shape_cast %19 : vector<2xf32> to vector<2x1xf32>
      %21 = vector.broadcast %20 : vector<2x1xf32> to vector<2x10xf32>
      %22 = arith.subf %17, %21 : vector<2x10xf32>
      %23 = math.exp %22 : vector<2x10xf32>
      %cst_14 = arith.constant dense<0.000000e+00> : vector<2xf32>
      %24 = vector.multi_reduction <add>, %23, %cst_14 [1] : vector<2x10xf32> to vector<2xf32>
      %25 = vector.shape_cast %24 : vector<2xf32> to vector<2x1xf32>
      %26 = tpu.reciprocal %25 {approx = true} : vector<2x1xf32> -> vector<2x1xf32>
      %27 = vector.broadcast %26 : vector<2x1xf32> to vector<2x10xf32>
      %28 = arith.mulf %23, %27 : vector<2x10xf32>
      %29 = vector.broadcast %20 : vector<2x1xf32> to vector<2x10xf32>
      %30 = arith.cmpf oeq, %17, %29 : vector<2x10xf32>
      %c10_i32 = arith.constant 10 : i32
      %31 = vector.broadcast %c10_i32 : i32 to vector<2x10xi32>
      %32 = arith.select %30, %18, %31 : vector<2x10xi1>, vector<2x10xi32>
      %cst_15 = arith.constant dense<2147483647> : vector<2xi32>
      %33 = vector.multi_reduction <minsi>, %32, %cst_15 [1] : vector<2x10xi32> to vector<2xi32>
      %34 = vector.shape_cast %33 : vector<2xi32> to vector<2x1xi32>
      %35 = vector.extract_strided_slice %28 {offsets = [0, 0], sizes = [1, 10], strides = [1, 1]} : vector<2x10xf32> to vector<1x10xf32>
      %36 = vector.shape_cast %35 : vector<1x10xf32> to vector<1x1x10xf32>
      %cst_16 = arith.constant dense<0.000000e+00> : vector<1xf32>
      %37 = vector.multi_reduction <add>, %36, %cst_16 [1, 2] : vector<1x1x10xf32> to vector<1xf32>
      %38 = vector.shape_cast %37 : vector<1xf32> to vector<1x1x1xf32>
      %39 = vector.extract %38[0, 0, 0] : f32 from vector<1x1x1xf32>
      %40 = vector.broadcast %39 : f32 to vector<1x1xf32>
      %cst_17 = arith.constant 1.000000e+01 : f32
      %41 = vector.broadcast %cst_17 : f32 to vector<1x1xf32>
      %42 = arith.divf %40, %41 : vector<1x1xf32>
      %cst_18 = arith.constant dense<0.000000e+00> : vector<10xf32>
      %43 = vector.multi_reduction <add>, %28, %cst_18 [0] : vector<2x10xf32> to vector<10xf32>
      %44 = vector.shape_cast %43 : vector<10xf32> to vector<1x10xf32>
      %cst_19 = arith.constant 2.000000e+00 : f32
      %45 = vector.broadcast %cst_19 : f32 to vector<1x10xf32>
      %46 = arith.divf %44, %45 : vector<1x10xf32>
      %47 = arith.cmpf ogt, %12, %13 : f32
      %48 = arith.extui %47 : i1 to i32
      %49 = arith.sitofp %48 : i32 to f32
      %50 = vector.broadcast %15 : f32 to vector<1x1xf32>
      %51 = arith.subf %42, %50 : vector<1x1xf32>
      %cst_20 = arith.constant 0.000000e+00 : f32
      %52 = vector.broadcast %cst_20 : f32 to vector<1x1xf32>
      %53 = arith.maximumf %51, %52 : vector<1x1xf32>
      %54 = vector.broadcast %49 : f32 to vector<1x1xf32>
      %55 = arith.mulf %53, %54 : vector<1x1xf32>
      %cst_21 = arith.constant 1.000000e+00 : f32
      %56 = arith.subf %cst_21, %14 : f32
      %57 = vector.broadcast %56 : f32 to vector<1x1xf32>
      %58 = arith.mulf %57, %55 : vector<1x1xf32>
      %59 = vector.broadcast %12 : f32 to vector<1x1xf32>
      %60 = arith.subf %59, %58 : vector<1x1xf32>
      %c0_22 = arith.constant 0 : index
      %c0_23 = arith.constant 0 : index
      %61 = vector.load %arg3[%c0_22, %c0_23] : memref<1x10xf32, #tpu.memory_space<vmem>>, vector<1x10xf32>
      %62 = vector.broadcast %13 : f32 to vector<1x10xf32>
      %63 = arith.cmpf ogt, %61, %62 : vector<1x10xf32>
      %64 = arith.extui %63 : vector<1x10xi1> to vector<1x10xi32>
      %65 = arith.sitofp %64 : vector<1x10xi32> to vector<1x10xf32>
      %66 = vector.broadcast %16 : f32 to vector<1x10xf32>
      %67 = arith.subf %46, %66 : vector<1x10xf32>
      %cst_24 = arith.constant 0.000000e+00 : f32
      %68 = vector.broadcast %cst_24 : f32 to vector<1x10xf32>
      %69 = arith.maximumf %67, %68 : vector<1x10xf32>
      %70 = arith.mulf %69, %65 : vector<1x10xf32>
      %cst_25 = arith.constant 1.000000e+00 : f32
      %71 = arith.subf %cst_25, %14 : f32
      %72 = vector.broadcast %71 : f32 to vector<1x10xf32>
      %73 = arith.mulf %72, %70 : vector<1x10xf32>
      %74 = arith.subf %61, %73 : vector<1x10xf32>
      %cst_26 = arith.constant 2.000000e+00 : f32
      %75 = vector.broadcast %cst_26 : f32 to vector<1x10xf32>
      %76 = arith.mulf %75, %74 : vector<1x10xf32>
      %77 = vector.broadcast %60 : vector<1x1xf32> to vector<1x10xf32>
      %78 = arith.mulf %76, %77 : vector<1x10xf32>
      %79 = vector.broadcast %60 : vector<1x1xf32> to vector<1x10xf32>
      %80 = arith.addf %74, %79 : vector<1x10xf32>
      %81 = tpu.reciprocal %80 {approx = true} : vector<1x10xf32> -> vector<1x10xf32>
      %82 = arith.mulf %78, %81 : vector<1x10xf32>
      %83 = vector.broadcast %82 : vector<1x10xf32> to vector<2x10xf32>
      %84 = arith.cmpf ogt, %28, %83 : vector<2x10xf32>
      %85 = arith.extui %84 : vector<2x10xi1> to vector<2x10xi32>
      %86 = arith.sitofp %85 : vector<2x10xi32> to vector<2x10xf32>
      %cst_27 = arith.constant dense<0xFF800000> : vector<2xf32>
      %87 = vector.multi_reduction <maximumf>, %86, %cst_27 [1] : vector<2x10xf32> to vector<2xf32>
      %88 = vector.shape_cast %87 : vector<2xf32> to vector<2x1xf32>
      %89 = vector.broadcast %88 : vector<2x1xf32> to vector<2x10xf32>
      %90 = arith.cmpf oeq, %86, %89 : vector<2x10xf32>
      %c10_i32_28 = arith.constant 10 : i32
      %91 = vector.broadcast %c10_i32_28 : i32 to vector<2x10xi32>
      %92 = arith.select %90, %18, %91 : vector<2x10xi1>, vector<2x10xi32>
      %cst_29 = arith.constant dense<2147483647> : vector<2xi32>
      %93 = vector.multi_reduction <minsi>, %92, %cst_29 [1] : vector<2x10xi32> to vector<2xi32>
      %94 = vector.shape_cast %93 : vector<2xi32> to vector<2x1xi32>
      %95 = vector.broadcast %94 : vector<2x1xi32> to vector<2x10xi32>
      %96 = arith.cmpi eq, %18, %95 : vector<2x10xi32>
      %97 = arith.extui %96 : vector<2x10xi1> to vector<2x10xi32>
      %98 = arith.sitofp %97 : vector<2x10xi32> to vector<2x10xf32>
      %cst_30 = arith.constant dense<0.000000e+00> : vector<10xf32>
      %99 = vector.multi_reduction <add>, %98, %cst_30 [0] : vector<2x10xf32> to vector<10xf32>
      %100 = vector.shape_cast %99 : vector<10xf32> to vector<1x10xf32>
      %c0_31 = arith.constant 0 : index
      %c0_32 = arith.constant 0 : index
      %101 = vector.load %arg9[%c0_31, %c0_32] : memref<1x10xf32, #tpu.memory_space<vmem>>, vector<1x10xf32>
      tpu.vector_store %arg9[%c0_31, %c0_32], %100 {strides = array<i32>} : memref<1x10xf32, #tpu.memory_space<vmem>>, vector<1x10xf32>,
      %cst_33 = arith.constant 1.000000e+00 : f32
      %102 = vector.broadcast %cst_33 : f32 to vector<2x1xf32>
      %103 = arith.subf %102, %88 : vector<2x1xf32>
      %104 = vector.broadcast %103 : vector<2x1xf32> to vector<2x10xf32>
      %105 = arith.mulf %104, %28 : vector<2x10xf32>
      %106 = vector.broadcast %34 : vector<2x1xi32> to vector<2x10xi32>
      %107 = arith.cmpi eq, %18, %106 : vector<2x10xi32>
      %cst_34 = arith.constant 1.000000e+01 : f32
      %108 = vector.broadcast %cst_34 : f32 to vector<2x1xf32>
      %109 = arith.mulf %88, %108 : vector<2x1xf32>
      %110 = vector.broadcast %109 : vector<2x1xf32> to vector<2x10xf32>
      %111 = arith.addf %110, %105 : vector<2x10xf32>
      %112 = arith.select %107, %111, %105 : vector<2x10xi1>, vector<2x10xf32>
      %c0_35 = arith.constant 0 : index
      %c0_36 = arith.constant 0 : index
      %113 = vector.load %arg10[%c0_35, %c0_36] : memref<2x10xf32, #tpu.memory_space<vmem>>, vector<2x10xf32>
      %c0_37 = arith.constant 0 : index
      %c0_38 = arith.constant 0 : index
      %114 = vector.load %arg5[%c0_37, %c0_38] : memref<1x10xf32, #tpu.memory_space<vmem>>, vector<1x10xf32>
      %115 = vector.broadcast %114 : vector<1x10xf32> to vector<2x10xf32>
      %116 = arith.addf %113, %115 : vector<2x10xf32>
      %cst_39 = arith.constant dense<0xFF800000> : vector<2xf32>
      %117 = vector.multi_reduction <maximumf>, %116, %cst_39 [1] : vector<2x10xf32> to vector<2xf32>
      %118 = vector.shape_cast %117 : vector<2xf32> to vector<2x1xf32>
      %119 = vector.broadcast %118 : vector<2x1xf32> to vector<2x10xf32>
      %120 = arith.subf %116, %119 : vector<2x10xf32>
      %121 = math.exp %120 : vector<2x10xf32>
      %cst_40 = arith.constant dense<0.000000e+00> : vector<2xf32>
      %122 = vector.multi_reduction <add>, %121, %cst_40 [1] : vector<2x10xf32> to vector<2xf32>
      %123 = vector.shape_cast %122 : vector<2xf32> to vector<2x1xf32>
      %124 = math.log %123 : vector<2x1xf32>
      %125 = vector.broadcast %124 : vector<2x1xf32> to vector<2x10xf32>
      %126 = arith.subf %120, %125 : vector<2x10xf32>
      %127 = arith.mulf %112, %126 : vector<2x10xf32>
      %cst_41 = arith.constant dense<0.000000e+00> : vector<2xf32>
      %128 = vector.multi_reduction <add>, %127, %cst_41 [1] : vector<2x10xf32> to vector<2xf32>
      %129 = vector.shape_cast %128 : vector<2xf32> to vector<2x1xf32>
      %cst_42 = arith.constant 0.000000e+00 : f32
      %130 = vector.broadcast %cst_42 : f32 to vector<2x1xf32>
      %131 = arith.subf %130, %129 : vector<2x1xf32>
      %c0_43 = arith.constant 0 : index
      %c0_44 = arith.constant 0 : index
      %132 = vector.load %arg4[%c0_43, %c0_44] : memref<2x1xf32, #tpu.memory_space<vmem>>, vector<2x1xf32>
      %133 = arith.mulf %131, %132 : vector<2x1xf32>
      %134 = vector.shape_cast %133 : vector<2x1xf32> to vector<1x2x1xf32>
      %cst_45 = arith.constant dense<0.000000e+00> : vector<1xf32>
      %135 = vector.multi_reduction <add>, %134, %cst_45 [1, 2] : vector<1x2x1xf32> to vector<1xf32>
      %136 = vector.shape_cast %135 : vector<1xf32> to vector<1x1x1xf32>
      %137 = vector.extract %136[0, 0, 0] : f32 from vector<1x1x1xf32>
      %138 = vector.broadcast %137 : f32 to vector<1x1xf32>
      %cst_46 = arith.constant 5.000000e-01 : f32
      %139 = vector.broadcast %cst_46 : f32 to vector<1x1xf32>
      %140 = arith.mulf %138, %139 : vector<1x1xf32>
      %c0_47 = arith.constant 0 : index
      %c0_48 = arith.constant 0 : index
      %141 = vector.load %arg8[%c0_47, %c0_48] : memref<1x1xf32, #tpu.memory_space<vmem>>, vector<1x1xf32>
      tpu.vector_store %arg8[%c0_47, %c0_48], %140 {strides = array<i32>} : memref<1x1xf32, #tpu.memory_space<vmem>>, vector<1x1xf32>,
    } else {
    }
    return
  }
  func.func @transform_0(%arg0: i32) -> i32 {
    %c0_i32 = arith.constant 0 : i32
    %c0_i32_0 = arith.constant 0 : i32
    return %c0_i32 : i32
  }
  func.func @transform_1(%arg0: i32) -> (i32, i32) {
    %c0_i32 = arith.constant 0 : i32
    %c0_i32_0 = arith.constant 0 : i32
    %c0_i32_1 = arith.constant 0 : i32
    return %c0_i32, %c0_i32_0 : i32, i32
  }
  func.func @transform_2(%arg0: i32) -> (i32, i32) {
    %c0_i32 = arith.constant 0 : i32
    %c0_i32_0 = arith.constant 0 : i32
    %c0_i32_1 = arith.constant 0 : i32
    return %c0_i32, %c0_i32_0 : i32, i32
  }
  func.func @transform_3(%arg0: i32) -> (i32, i32) {
    %c0_i32 = arith.constant 0 : i32
    %c0_i32_0 = arith.constant 0 : i32
    %c0_i32_1 = arith.constant 0 : i32
    return %c0_i32, %c0_i32_0 : i32, i32
  }
  func.func @transform_4(%arg0: i32) -> (i32, i32) {
    %c0_i32 = arith.constant 0 : i32
    %c0_i32_0 = arith.constant 0 : i32
    %c0_i32_1 = arith.constant 0 : i32
    return %c0_i32, %c0_i32_0 : i32, i32
  }
  func.func @transform_5(%arg0: i32) -> (i32, i32) {
    %c0_i32 = arith.constant 0 : i32
    %c0_i32_0 = arith.constant 0 : i32
    return %c0_i32, %arg0 : i32, i32
  }
  func.func @transform_6(%arg0: i32) -> (i32, i32) {
    %c0_i32 = arith.constant 0 : i32
    %c0_i32_0 = arith.constant 0 : i32
    return %arg0, %c0_i32 : i32, i32
  }
  func.func @transform_7(%arg0: i32) -> (i32, i32) {
    %c0_i32 = arith.constant 0 : i32
    %c0_i32_0 = arith.constant 0 : i32
    %c0_i32_1 = arith.constant 0 : i32
    return %c0_i32, %c0_i32_0 : i32, i32
  }
  func.func @transform_8(%arg0: i32) -> (i32, i32) {
    %c0_i32 = arith.constant 0 : i32
    %c0_i32_0 = arith.constant 0 : i32
    %c0_i32_1 = arith.constant 0 : i32
    return %c0_i32, %c0_i32_0 : i32, i32
  }
}

</mosaic_0001>

<bundles_post_ra>
// kernel: tpu_custom_call.1
= control target key start
LH: loop header
LB: loop body
LE: loop exit
PB: predicated region body
PF: predicated region fallthrough
CT: control target
= control target key end

     0   :  { %14 = vsyncpa [#allocation5], 0  ;;  %s1632_s0 = inlined_call_operand.vmem [shape: f32[5], index: 0, kind: input, shape index: {}]   ;;  %s1633_s1 = inlined_call_operand.vmem [shape: f32[2,10], index: 1, kind: input, shape index: {}]   ;;  %s1634_s2 = inlined_call_operand.vmem [shape: f32[1,10], index: 2, kind: input, shape index: {}]   ;;  %s1635_s3 = inlined_call_operand.vmem [shape: f32[2,1], index: 3, kind: input, shape index: {}]   ;;  %s1636_s4 = inlined_call_operand.vmem [shape: f32[1,10], index: 4, kind: input, shape index: {}]   ;;  %s1637_s5 = inlined_call_operand.vmem [shape: bf16[2,1024], index: 5, kind: input, shape index: {}]   ;;  %s1638_s6 = inlined_call_operand.vmem [shape: bf16[1024,10], index: 6, kind: input, shape index: {}]   ;;  %s1639_s7 = inlined_call_operand.hbm [shape: f32[1,1], index: 7, kind: output, shape index: {0}]   ;;  %s1640_s8 = inlined_call_operand.hbm [shape: f32[1,10], index: 8, kind: output, shape index: {1}]  }
   0x1   :  { %15 = vsyncpa [#allocation4], 0 }
   0x2   :  { %16 = vsyncpa [#allocation8], 0  ;;  %s23_s29 = sshll.u32 %s1632_s0, 4  ;;  %s24_s29 = int_to_ptr.vmem [resolvable:$true] %s23_s29 }
   0x3   :  { %s1238_s30 = scalar_lea.vmem %s24_s29, 16  ;;  %p1243_p1 = scmp.lt.s32.totalorder %s24_s29, %s24_s29 }
   0x4   :  { %p1239_p0 = scmp.ne.s32.totalorder %s24_s29, %s1238_s30  ;;  %p1244_p2 = scmp.lt.s32.totalorder %s1238_s30, %s1238_s30 }
   0x6   :  { %p1245_p3 = por %p1244_p2, %p1243_p1 }
   0x8   :  { %p1246_p4 = pnand %p1245_p3, %p1239_p0 }
   0xa   :  { %1249 = shalt.err (!%p1246_p4)
}
   0xb   :  { %s1296_s9 = smov [#allocation3]  }
   0xc   :  { %26 = dma.vmem_to_smem %s24_s29, 16, %s1296_s9, [#allocation5]  }
   0xd   :  { %1290 = dma.done.wait [#allocation5], 16  }
   0xe   :  { %1291 = vsyncadd [#allocation5], 4294967280 }
   0xf   :  { %42 = sfence }
  0x10   :  { %vm48_vm0 = vcmask 74752   ;;  %v1352_v0 = vld [vmem:[%s1633_s1] sm:$0x3]  ;;  %v1163_v1 = vld [vmem:[%s1638_s6 + $0x78] sm:$0xff]   ;;  %v1167_v6 = vld [vmem:[%s1638_s6 + $0x70] sm:$0xff]   ;;  %v185_v31 = vlaneseq  ;;  %vm824_vm2 = vcmask 73728  }
  0x11   :  { %v796_v2 = vsel %vm48_vm0, %v1352_v0, -inf  ;;  %v1164_v3 = vld [vmem:[%s1638_s6 + $0x38] sm:$0xff]   ;;  %1066 = vmatprep.subr.bf16.mxu0 %v1163_v1  ;;  %v1168_v7 = vld [vmem:[%s1638_s6 + $0x30] sm:$0xff]   ;;  %v1171_v10 = vld [vmem:[%s1638_s6 + $0x68] sm:$0xff]   ;;  %v1297_v35 = vmov 1966171168  }
  0x12   :  { %797 = vmax.xlane.f32.xlu0 %v796_v2  ;;  %1067 = vmatpush3.bf16.msra.mxu0 %v1164_v3  ;;  %v1165_v4 = vld [vmem:[%s1638_s6 + $0xf8] sm:$0xff]   ;;  %v1169_v8 = vld [vmem:[%s1638_s6 + $0xf0] sm:$0xff]   ;;  %v1172_v11 = vld [vmem:[%s1638_s6 + $0x28] sm:$0xff]   ;;  %v183_v36 = vunpack.c.l.s4 %v1297_v35  ;;  %v1453_v37 = vshrl.u32 %v185_v31, 7  ;;  %s788_s18 = sld [smem:[#allocation3]]  ;;  %vm950_vm9 = vcmask 1024  }
  0x13   :  { %v1166_v5 = vld [vmem:[%s1638_s6 + $0xb8] sm:$0xff]   ;;  %1088 = vmatprep.subr.bf16.mxu1 %v1165_v4  ;;  %1068 = vmatprep.subr.bf16.mxu0 %v1167_v6  ;;  %v1170_v9 = vld [vmem:[%s1638_s6 + $0xb0] sm:$0xff]   ;;  %v1173_v12 = vld [vmem:[%s1638_s6 + $0xe8] sm:$0xff]   ;;  %s1058_s19 = sld [smem:[#allocation3 + $0x1]] }
  0x14   :  { %1089 = vmatpush3.bf16.msra.mxu1 %v1166_v5  ;;  %v1174_v13 = vld [vmem:[%s1638_s6 + $0xa8] sm:$0xff]   ;;  %v1175_v14 = vld [vmem:[%s1638_s6 + $0x60] sm:$0xff]   ;;  %v1179_v18 = vld [vmem:[%s1638_s6 + $0x58] sm:$0xff]   ;;  %v184_v41 = vunpack.c.0.s8 %v183_v36  ;;  %s1059_s20 = sld [smem:[#allocation3 + $0x2]] }
  0x15   :  { %1090 = vmatprep.subr.bf16.mxu1 %v1169_v8  ;;  %v1176_v15 = vld [vmem:[%s1638_s6 + $0x20] sm:$0xff]   ;;  %v1180_v19 = vld [vmem:[%s1638_s6 + $0x18] sm:$0xff]   ;;  %v1183_v22 = vld [vmem:[%s1638_s6 + $0x50] sm:$0xff]   ;;  %s1060_s21 = sld [smem:[#allocation3 + $0x3]] }
  0x16   :  { %1069 = vmatpush3.bf16.msra.mxu0 %v1168_v7  ;;  %v1177_v16 = vld [vmem:[%s1638_s6 + $0xe0] sm:$0xff]   ;;  %v1181_v20 = vld [vmem:[%s1638_s6 + $0xd8] sm:$0xff]   ;;  %v1184_v23 = vld [vmem:[%s1638_s6 + $0x10] sm:$0xff]   ;;  %v1465_v43 = vsub.s32 %v184_v41, %v1453_v37 }
  0x17   :  { %1070 = vmatprep.subr.bf16.mxu0 %v1171_v10  ;;  %v1178_v17 = vld [vmem:[%s1638_s6 + $0xa0] sm:$0xff]   ;;  %v1182_v21 = vld [vmem:[%s1638_s6 + $0x98] sm:$0xff]   ;;  %v1185_v24 = vld [vmem:[%s1638_s6 + $0xd0] sm:$0xff]  }
  0x18   :  { %1091 = vmatpush3.bf16.msra.mxu1 %v1170_v9  ;;  %v1186_v25 = vld [vmem:[%s1638_s6 + $0x90] sm:$0xff]   ;;  %v1187_v26 = vld [vmem:[%s1638_s6 + $0x48] sm:$0xff]   ;;  %v1191_v30 = vld [vmem:[%s1638_s6 + $0x40] sm:$0xff]  }
  0x19   :  { %1092 = vmatprep.subr.bf16.mxu1 %v1173_v12  ;;  %v1188_v27 = vld [vmem:[%s1638_s6 + $0x8] sm:$0xff]   ;;  %v1192_v32 = vld [vmem:[%s1638_s6] sm:$0xff]   ;;  %v1196_v38 = vld [vmem:[%s1638_s6 + $0x178] sm:$0xff]   ;;  %p847_p5 = scmp.gt.f32.partialorder %s788_s18, %s1058_s19 }
  0x1a   :  { %1071 = vmatpush3.bf16.msra.mxu0 %v1172_v11  ;;  %v1189_v28 = vld [vmem:[%s1638_s6 + $0xc8] sm:$0xff]   ;;  %v1193_v33 = vld [vmem:[%s1638_s6 + $0xc0] sm:$0xff]   ;;  %v1198_v42 = vld [vmem:[%s1638_s6 + $0x1f8] sm:$0xff]   ;;  %s855_s27 = ssub.f32 1.0, %s1059_s20 }
  0x1b   :  { %1072 = vmatprep.subr.bf16.mxu0 %v1175_v14  ;;  %v1190_v29 = vld [vmem:[%s1638_s6 + $0x88] sm:$0xff]   ;;  %v1194_v34 = vld [vmem:[%s1638_s6 + $0x80] sm:$0xff]   ;;  %v1197_v50 = vld [vmem:[%s1638_s6 + $0x138] sm:$0xff]   ;;  %s848_s24 = scalar_select %p847_p5, 1, 0 }
  0x1c   :  { %1093 = vmatpush3.bf16.msra.mxu1 %v1174_v13  ;;  %v51_v39 = vld [vmem:[%s1637_s5] sm:$0xff]  ;;  %v1200_v53 = vld [vmem:[%s1638_s6 + $0x170] sm:$0xff]   ;;  %v1199_v55 = vld [vmem:[%s1638_s6 + $0x1b8] sm:$0xff]  }
  0x1d   :  { %1094 = vmatprep.subr.bf16.mxu1 %v1177_v16  ;;  %v181_v40 = vcombine.high %v51_v39, %v51_v39  ;;  %v188_v44 = vrot.slane %v51_v39, %v1465_v43  ;;  %v1202_v56 = vld [vmem:[%s1638_s6 + $0x1f0] sm:$0xff]   ;;  %v1204_v59 = vld [vmem:[%s1638_s6 + $0x168] sm:$0xff]   ;;  %v1208_v63 = vld [vmem:[%s1638_s6 + $0x160] sm:$0xff]   ;;  %s849_s26 = scvt.s32.f32 %s848_s24 }
  0x1e   :  { %1073 = vmatpush3.bf16.msra.mxu0 %v1176_v15  ;;  %v1201_v58 = vld [vmem:[%s1638_s6 + $0x130] sm:$0xff]   ;;  %v1206_v61 = vld [vmem:[%s1638_s6 + $0x1e8] sm:$0xff]   ;;  %v1210_v2 = vld [vmem:[%s1638_s6 + $0x1e0] sm:$0xff]  }
  0x1f   :  { %1074 = vmatprep.subr.bf16.mxu0 %v1179_v18  ;;  %v1469_v45 = vrot.slane %v181_v40, %v1465_v43  ;;  %v196_v46 = vcombine.high %v188_v44, %v188_v44  ;;  %v204_v47 = vrot.slane %v188_v44, %v1465_v43  ;;  %v1203_v60 = vld [vmem:[%s1638_s6 + $0x1b0] sm:$0xff]   ;;  %v1205_v62 = vld [vmem:[%s1638_s6 + $0x128] sm:$0xff]   ;;  %v1209_v3 = vld [vmem:[%s1638_s6 + $0x120] sm:$0xff]  }
  0x20   :  { %1095 = vmatpush3.bf16.msra.mxu1 %v1178_v17  ;;  %v1207_v1 = vld [vmem:[%s1638_s6 + $0x1a8] sm:$0xff]   ;;  %v1212_v4 = vld [vmem:[%s1638_s6 + $0x158] sm:$0xff]   ;;  %v1211_v5 = vld [vmem:[%s1638_s6 + $0x1a0] sm:$0xff]  }
  0x21   :  { %1096 = vmatprep.subr.bf16.mxu1 %v1181_v20  ;;  %v197_v48 = vcombine.high %v1469_v45, %v1469_v45  ;;  %v218_v49 = vrot.slane %v196_v46, %v1465_v43  ;;  %v226_v52 = vcombine.high %v204_v47, %v204_v47  ;;  %v1214_v6 = vld [vmem:[%s1638_s6 + $0x1d8] sm:$0xff]   ;;  %v1216_v8 = vld [vmem:[%s1638_s6 + $0x150] sm:$0xff]   ;;  %v1220_v12 = vld [vmem:[%s1638_s6 + $0x148] sm:$0xff]   ;;  %v211_v20 = vrot.slane %v1469_v45, %v1465_v43 }
  0x22   :  { %1075 = vmatpush3.bf16.msra.mxu0 %v1180_v19  ;;  %v1213_v7 = vld [vmem:[%s1638_s6 + $0x118] sm:$0xff]   ;;  %v1218_v10 = vld [vmem:[%s1638_s6 + $0x1d0] sm:$0xff]   ;;  %v1222_v14 = vld [vmem:[%s1638_s6 + $0x1c8] sm:$0xff]  }
  0x23   :  { %1076 = vmatprep.subr.bf16.mxu0 %v1183_v22  ;;  %v225_v51 = vrot.slane %v197_v48, %v1465_v43  ;;  %654 = vmatprep.mubr.bf16.mxu0 %v218_v49  ;;  %v228_v54 = vcombine.high %v218_v49, %v218_v49  ;;  %v1215_v9 = vld [vmem:[%s1638_s6 + $0x198] sm:$0xff]   ;;  %v1217_v11 = vld [vmem:[%s1638_s6 + $0x110] sm:$0xff]   ;;  %v1221_v15 = vld [vmem:[%s1638_s6 + $0x108] sm:$0xff]   ;;  %v227_v22 = vcombine.high %v211_v20, %v211_v20 }
  0x24   :  { %1097 = vmatpush3.bf16.msra.mxu1 %v1182_v21  ;;  %v1219_v13 = vld [vmem:[%s1638_s6 + $0x190] sm:$0xff]   ;;  %v1224_v16 = vld [vmem:[%s1638_s6 + $0x140] sm:$0xff]   ;;  %v1223_v17 = vld [vmem:[%s1638_s6 + $0x188] sm:$0xff]  }
  0x25   :  { %1098 = vmatprep.subr.bf16.mxu1 %v1185_v24  ;;  %v229_v57 = vcombine.high %v225_v51, %v225_v51  ;;  %694 = vmatprep.mubr.bf16.mxu1 %v228_v54  ;;  %v1226_v18 = vld [vmem:[%s1638_s6 + $0x1c0] sm:$0xff]  }
  0x26   :  { %1077 = vmatpush3.bf16.msra.mxu0 %v1184_v23  ;;  %v1225_v19 = vld [vmem:[%s1638_s6 + $0x100] sm:$0xff]  }
  0x27   :  { %1078 = vmatprep.subr.bf16.mxu0 %v1187_v26  ;;  %v1227_v21 = vld [vmem:[%s1638_s6 + $0x180] sm:$0xff]   ;;  %v1570_v26 = vand.u32 127, %v185_v31 }
  0x28   :  { %1099 = vmatpush3.bf16.msra.mxu1 %v1186_v25 }
  0x29   :  { %1100 = vmatprep.subr.bf16.mxu1 %v1189_v28 }
  0x2a   :  { %1079 = vmatpush3.bf16.msra.mxu0 %v1188_v27 }
  0x2b   :  { %1080 = vmatprep.subr.bf16.mxu0 %v1191_v30 }
  0x2c   :  { %1101 = vmatpush3.bf16.msra.mxu1 %v1190_v29 }
  0x2d   :  { %1102 = vmatprep.subr.bf16.mxu1 %v1193_v33 }
  0x2e   :  { %1081 = vmatpush3.bf16.msra.mxu0 %v1192_v32 }
  0x2f   :  { %1110 = vmatprep.subr.bf16.mxu0 %v1196_v38 }
  0x30   :  { %1103 = vmatpush3.bf16.msra.mxu1 %v1194_v34  ;;  %v1298_v34 = vmov 0.0  }
  0x31   :  { %1132 = vmatprep.subr.bf16.mxu1 %v1198_v42  ;;  %655 = vmatmul.mubr.bf16.vlgmr.msra.gmra.mxu0 %v204_v47  ;;  %49 = vst.msk [vmem:[#allocation2] sm:$0x3] %vm48_vm0, %v1298_v34 }
  0x32   :  { %1111 = vmatpush3.bf16.msra.mxu0 %v1197_v50  ;;  %734 = vmatprep.mubr.bf16.mxu0 %v225_v51 }
  0x33   :  { %695 = vmatmul.mubr.bf16.vlgmr.msra.gmra.mxu1 %v226_v52  ;;  %1112 = vmatprep.subr.bf16.mxu0 %v1200_v53 }
  0x34   :  { %1133 = vmatpush3.bf16.msra.mxu1 %v1199_v55  ;;  %774 = vmatprep.mubr.bf16.mxu1 %v229_v57 }
  0x35   :  { %1134 = vmatprep.subr.bf16.mxu1 %v1202_v56 }
  0x36   :  { %1113 = vmatpush3.bf16.msra.mxu0 %v1201_v58 }
  0x37   :  { %1114 = vmatprep.subr.bf16.mxu0 %v1204_v59 }
  0x38   :  { %1135 = vmatpush3.bf16.msra.mxu1 %v1203_v60  ;;  %v50_v53 = vld [vmem:[#allocation2] sm:$0x3] }
  0x39   :  { %1136 = vmatprep.subr.bf16.mxu1 %v1206_v61  ;;  %v1065_v61 = vld [vmem:[%s1636_s4] ss:$0 sm:$0xff]  ;;  %s1061_s4 = sld [smem:[#allocation3 + $0x4]] }
  0x3a   :  { %1115 = vmatpush3.bf16.msra.mxu0 %v1205_v62 }
  0x3b   :  { %1116 = vmatprep.subr.bf16.mxu0 %v1208_v63 }
  0x3c   :  { %1137 = vmatpush3.bf16.msra.mxu1 %v1207_v1 }
  0x3d   :  { %1138 = vmatprep.subr.bf16.mxu1 %v1210_v2 }
  0x3e   :  { %1117 = vmatpush3.bf16.msra.mxu0 %v1209_v3 }
  0x3f   :  { %1118 = vmatprep.subr.bf16.mxu0 %v1212_v4 }
  0x40   :  { %1139 = vmatpush3.bf16.msra.mxu1 %v1211_v5 }
  0x41   :  { %1140 = vmatprep.subr.bf16.mxu1 %v1214_v6 }
  0x42   :  { %1119 = vmatpush3.bf16.msra.mxu0 %v1213_v7 }
  0x43   :  { %1120 = vmatprep.subr.bf16.mxu0 %v1216_v8 }
  0x44   :  { %1141 = vmatpush3.bf16.msra.mxu1 %v1215_v9 }
  0x45   :  { %1142 = vmatprep.subr.bf16.mxu1 %v1218_v10 }
  0x46   :  { %1121 = vmatpush3.bf16.msra.mxu0 %v1217_v11 }
  0x47   :  { %1122 = vmatprep.subr.bf16.mxu0 %v1220_v12 }
  0x48   :  { %1143 = vmatpush3.bf16.msra.mxu1 %v1219_v13 }
  0x49   :  { %1144 = vmatprep.subr.bf16.mxu1 %v1222_v14 }
  0x4a   :  { %1123 = vmatpush3.bf16.msra.mxu0 %v1221_v15 }
  0x4b   :  { %1124 = vmatprep.subr.bf16.mxu0 %v1224_v16 }
  0x4c   :  { %1145 = vmatpush3.bf16.msra.mxu1 %v1223_v17 }
  0x4d   :  { %1146 = vmatprep.subr.bf16.mxu1 %v1226_v18 }
  0x4e   :  { %1125 = vmatpush3.bf16.msra.mxu0 %v1225_v19 }
  0x50   :  { %1147 = vmatpush3.bf16.msra.mxu1 %v1227_v21 }
  0x51   :  { %735 = vmatmul.mubr.bf16.vlgmr.msra.gmra.mxu0 %v211_v20 }
  0x53   :  { %775 = vmatmul.mubr.bf16.vlgmr.msra.gmra.mxu1 %v227_v22 }
  0x9b   :  { %v798_v23 = vpop.xlane.xlu0 %797 }
  0x9c   :  { %v799_v24 = vsub.f32 %v1352_v0, %v798_v23  ;;  %vm807_vm1 = vcmp.eq.f32.partialorder %v1352_v0, %v798_v23 }
  0x9d   :  { %v808_v27 = vsel %vm807_vm1, %v1570_v26, 10 }
  0x9e   :  { %v800_v25 = vmul.f32 1.442695, %v799_v24  ;;  %v1575_v28 = vsel %vm48_vm0, %v808_v27, 2147483647 }
  0x9f   :  { %v811_v30 = vshra.s32 %v1575_v28, 16  ;;  %v810_v15 = vand.u32 65535, %v1575_v28 }
  0xa0   :  { %1228 = vpow2.f32 %v800_v25 }
  0xa1   :  { %v1579_v33 = vcvt.s32.f32 %v811_v30  ;;  %v812_v18 = vcvt.s32.f32 %v810_v15  ;;  %v860_v30 = vld [vmem:[%s1634_s2] sm:$0x1] }
  0xad   :  { %v1229_v29 = vpop.eup %1228 }
  0xae   :  { %v802_v32 = vsel %vm48_vm0, %v1229_v29, 0.0 }
  0xaf   :  { %803 = vadd.xlane.f32.xlu0 %v802_v32  ;;  %v861_v32 = vstv %s1058_s19 }
  0xb0   :  { %vm862_vm4 = vcmp.gt.f32.partialorder %v860_v30, %v861_v32 }
  0xb3   :  { %814 = vmin.xlane.f32.xlu0 %v1579_v33 }
  0xf1   :  { %v1082_v0 = vpop.f32.mrf.mxu0 }
  0xf3   :  { %v1083_v31 = vpop.f32.mrf.mxu0  ;;  %v1104_v35 = vpop.f32.mrf.mxu1 }
  0xf4   :  { %v1084_v42 = vadd.f32 %v1083_v31, %v1082_v0 }
  0xf5   :  { %v1085_v36 = vpop.f32.mrf.mxu0  ;;  %v1105_v38 = vpop.f32.mrf.mxu1 }
  0xf6   :  { %v1106_v43 = vadd.f32 %v1105_v38, %v1104_v35  ;;  %v850_v35 = vstv %s1060_s21  ;;  %v1062_v36 = vsel %vm862_vm4, 1.0, %v1298_v34 }
  0xf7   :  { %v1086_v39 = vpop.f32.mrf.mxu0  ;;  %v1107_v40 = vpop.f32.mrf.mxu1 }
  0xf8   :  { %v697_v45 = vadd.f32 %v1106_v43, %v1084_v42  ;;  %v856_v42 = vstv %s855_s27 }
  0xf9   :  { %v1108_v41 = vpop.f32.mrf.mxu1 }
  0xfa   :  { %v853_v41 = vstv %s849_s26 }
 0x111   :  { %v1126_v44 = vpop.f32.mrf.mxu0 }
 0x113   :  { %v1127_v46 = vpop.f32.mrf.mxu0  ;;  %v1148_v47 = vpop.f32.mrf.mxu1 }
 0x114   :  { %v1128_v48 = vadd.f32 %v1127_v46, %v1126_v44  ;;  %v858_v46 = vstv %s788_s18 }
 0x115   :  { %v1149_v49 = vpop.f32.mrf.mxu1  ;;  %v1129_v50 = vpop.f32.mrf.mxu0 }
 0x116   :  { %v737_v51 = vadd.f32 %v1128_v48, %v697_v45  ;;  %v1150_v52 = vadd.f32 %v1149_v49, %v1148_v47 }
 0x117   :  { %v1130_v54 = vpop.f32.mrf.mxu0  ;;  %v1151_v55 = vpop.f32.mrf.mxu1 }
 0x118   :  { %v777_v56 = vadd.f32 %v1150_v52, %v737_v51 }
 0x119   :  { %v1152_v57 = vpop.f32.mrf.mxu1 }
 0x11a   :  { %v782_v58 = vadd.f32 %v777_v56, %v50_v53  ;;  %v879_v53 = vsub.s32 0, %v1453_v37 }
 0x11c   :  { %784 = vst.msk [vmem:[#allocation2] sm:$0x3] %vm48_vm0, %v782_v58 }
 0x123   :  { %v922_v60 = vld [vmem:[#allocation2] sm:$0x3] }
 0x124   :  { %v930_v1 = vadd.f32 %v1065_v61, %v922_v60 }
 0x126   :  { %v931_v3 = vsel %vm48_vm0, %v930_v1, -inf }
 0x138   :  { %v804_v59 = vpop.xlane.xlu0 %803 }
 0x139   :  { %1230 = vrcp.f32 %v804_v59 }
 0x13c   :  { %v1596_v14 = vpop.xlane.xlu0 %814 }
 0x13d   :  { %vm816_vm3 = vcmp.eq.f32.partialorder %v1579_v33, %v1596_v14  ;;  %v821_v61 = vcvt.f32.s32 %v1596_v14 }
 0x13e   :  { %v817_v20 = vsel %vm816_vm3, %v812_v18, inf }
 0x146   :  { %v1231_v62 = vpop.eup %1230 }
 0x147   :  { %v1588_v63 = vmul.f32 %v1231_v62, %v1229_v29  ;;  %v865_v29 = vstv %s1061_s4 }
 0x149   :  { %v825_v2 = vsel %vm824_vm2, %v1588_v63, 0.0  ;;  %v838_v19 = vsel %vm48_vm0, %v1588_v63, 0.0 }
 0x14a   :  { %826 = vadd.xlane.f32.xlu1 %v825_v2  ;;  %v839_v21 = vrot.slane %v838_v19, 4  ;;  %v822_v2 = vshll.u32 %v821_v61, 16 }
 0x14c   :  { %v840_v22 = vadd.f32 %v839_v21, %v838_v19 }
 0x14e   :  { %932 = vmax.xlane.f32.xlu1 %v931_v3  ;;  %v841_v23 = vrot.slane %v840_v22, 2 }
 0x150   :  { %v842_v24 = vadd.f32 %v841_v23, %v840_v22  ;;  %v948_v22 = vld [vmem:[%s1635_s3] sm:$0x3]  ;;  %s1299_s3 = smov [#allocation7]  }
 0x151   :  { %s981_s29 = sshll.u32 %s1299_s3, 4  ;;  %s982_s29 = int_to_ptr.vmem [resolvable:$true] %s981_s29 }
 0x152   :  { %v843_v25 = vrot.slane %v842_v24, 1  ;;  %s1250_s30 = scalar_lea.vmem %s982_s29, 16  ;;  %s1254_s9 = scalar_lea.vmem %s982_s29, 32 }
 0x153   :  { %p1251_p6 = scmp.ne.s32.totalorder %s982_s29, %s1250_s30  ;;  %p1255_p7 = scmp.lt.s32.totalorder %s982_s29, %s982_s29 }
 0x154   :  { %v844_v27 = vadd.f32 %v843_v25, %v842_v24  ;;  %p1256_p8 = scmp.lt.s32.totalorder %s1254_s9, %s1250_s30 }
 0x156   :  { %v846_v28 = vmul.f32 0.5, %v844_v27  ;;  %p1257_p9 = por %p1256_p8, %p1255_p7 }
 0x158   :  { %v866_v33 = vsub.f32 %v846_v28, %v865_v29  ;;  %p1258_p10 = pnand %p1257_p9, %p1251_p6 }
 0x15a   :  { %v867_v0 = vmax.f32 %v866_v33, 0.0 }
 0x15c   :  { %v868_v40 = vmul.f32 %v1062_v36, %v867_v0 }
 0x15e   :  { %v869_v45 = vmul.f32 %v868_v40, %v856_v42 }
 0x160   :  { %v870_v49 = vsub.f32 %v860_v30, %v869_v45 }
 0x162   :  { %v871_v51 = vmul.f32 2.0, %v870_v49 }
 0x1d3   :  { %v827_v4 = vpop.xlane.xlu1 %826 }
 0x1d4   :  { %v828_v5 = vrot.slane %v827_v4, 4 }
 0x1d6   :  { %v829_v6 = vadd.f32 %v828_v5, %v827_v4 }
 0x1d7   :  { %v933_v7 = vpop.xlane.xlu1 %932 }
 0x1d8   :  { %v830_v8 = vrot.slane %v829_v6, 2  ;;  %v1593_v9 = vsub.f32 %v930_v1, %v933_v7 }
 0x1da   :  { %v935_v10 = vmul.f32 1.442695, %v1593_v9  ;;  %v831_v11 = vadd.f32 %v830_v8, %v829_v6 }
 0x1dc   :  { %1232 = vpow2.f32 %v935_v10  ;;  %v832_v12 = vrot.slane %v831_v11, 1 }
 0x1de   :  { %v833_v13 = vadd.f32 %v832_v12, %v831_v11 }
 0x1e0   :  { %1154 = vpush %v833_v13 }
 0x1e9   :  { %v1233_v16 = vpop.eup %1232 }
 0x1ea   :  { %v937_v17 = vsel %vm48_vm0, %v1233_v16, 0.0 }
 0x1eb   :  { %938 = vadd.xlane.f32.xlu1 %v937_v17 }
 0x1ef   :  { %818 = vmin.xlane.f32.xlu1 %v817_v20 }
 0x211   :  { %s1155_s25 = spop %1154 }
 0x212   :  { %v835_v31 = vstv %s1155_s25 }
 0x213   :  { %v837_v38 = vmul.f32 0.1, %v835_v31 }
 0x215   :  { %v851_v39 = vsub.f32 %v837_v38, %v850_v35 }
 0x217   :  { %v852_v43 = vmax.f32 %v851_v39, 0.0 }
 0x219   :  { %v854_v44 = vmul.f32 %v853_v41, %v852_v43 }
 0x21b   :  { %v857_v47 = vmul.f32 %v856_v42, %v854_v44 }
 0x21d   :  { %v859_v48 = vsub.f32 %v858_v46, %v857_v47 }
 0x21f   :  { %v873_v50 = vadd.f32 %v870_v49, %v859_v48  ;;  %v872_v52 = vmul.f32 %v871_v51, %v859_v48 }
 0x221   :  { %1234 = vrcp.f32 %v873_v50 }
 0x22e   :  { %v1235_v54 = vpop.eup %1234 }
 0x22f   :  { %v875_v55 = vmul.f32 %v1235_v54, %v872_v52 }
 0x231   :  { %v880_v56 = vrot.slane %v875_v55, %v879_v53 }
 0x233   :  { %vm882_vm5 = vcmp.gt.f32.partialorder %v1588_v63, %v880_v56 }
 0x234   :  { %v1063_v57 = vsel %vm882_vm5, 1.0, %v1298_v34 }
 0x235   :  { %v885_v58 = vsel %vm48_vm0, %v1063_v57, -inf }
 0x236   :  { %886 = vmax.xlane.f32.xlu0 %v885_v58 }
 0x274   :  { %v939_v59 = vpop.xlane.xlu1 %938 }
 0x275   :  { %1236 = vlog2.f32 %v939_v59 }
 0x278   :  { %v819_v60 = vpop.xlane.xlu1 %818 }
 0x279   :  { %v820_v62 = vcvt.f32.s32 %v819_v60 }
 0x27b   :  { %v823_v5 = vadd.s32 %v822_v2, %v820_v62 }
 0x27d   :  { %vm918_vm7 = vcmp.eq.s32.totalorder %v1570_v26, %v823_v5 }
 0x282   :  { %v1237_v1 = vpop.eup %1236 }
 0x283   :  { %v941_v4 = vmul.f32 0.6931472, %v1237_v1 }
 0x285   :  { %v942_v14 = vsub.f32 %v1593_v9, %v941_v4 }
 0x2bf   :  { %v887_v3 = vpop.xlane.xlu0 %886 }
 0x2c0   :  { %vm888_vm6 = vcmp.eq.f32.partialorder %v1063_v57, %v887_v3  ;;  %v916_v37 = vsub.f32 1.0, %v887_v3  ;;  %v919_v8 = vmul.f32 10.0, %v887_v3 }
 0x2c1   :  { %v889_v6 = vsel %vm888_vm6, %v1570_v26, 10 }
 0x2c2   :  { %v917_v7 = vmul.f32 %v916_v37, %v1588_v63  ;;  %v890_v10 = vsel %vm48_vm0, %v889_v6, 2147483647 }
 0x2c3   :  { %v892_v11 = vshra.s32 %v890_v10, 16  ;;  %v891_v18 = vand.u32 65535, %v890_v10 }
 0x2c4   :  { %v920_v12 = vadd.f32 %v919_v8, %v917_v7 }
 0x2c5   :  { %v894_v13 = vcvt.s32.f32 %v892_v11  ;;  %v893_v20 = vcvt.s32.f32 %v891_v18 }
 0x2c6   :  { %v921_v15 = vsel %vm918_vm7, %v920_v12, %v917_v7 }
 0x2c7   :  { %895 = vmin.xlane.f32.xlu1 %v894_v13  ;;  %v943_v16 = vmul.f32 %v942_v14, %v921_v15 }
 0x2c9   :  { %v944_v17 = vsel %vm48_vm0, %v943_v16, 0.0 }
 0x2ca   :  { %945 = vadd.xlane.f32.xlu0 %v944_v17 }
 0x350   :  { %v896_v19 = vpop.xlane.xlu1 %895 }
 0x351   :  { %vm897_vm8 = vcmp.eq.f32.partialorder %v894_v13, %v896_v19  ;;  %v902_v25 = vcvt.f32.s32 %v896_v19 }
 0x352   :  { %v898_v63 = vsel %vm897_vm8, %v893_v20, inf }
 0x353   :  { %v946_v21 = vpop.xlane.xlu0 %945  ;;  %899 = vmin.xlane.f32.xlu1 %v898_v63  ;;  %v903_v28 = vshll.u32 %v902_v25, 16 }
 0x354   :  { %v947_v23 = vsub.f32 0.0, %v946_v21 }
 0x356   :  { %v949_v9 = vmul.f32 %v948_v22, %v947_v23 }
 0x358   :  { %v951_v24 = vsel %vm950_vm9, %v949_v9, 0.0 }
 0x359   :  { %952 = vadd.xlane.f32.xlu0 %v951_v24 }
 0x3dc   :  { %v900_v27 = vpop.xlane.xlu1 %899 }
 0x3dd   :  { %v901_v29 = vcvt.f32.s32 %v900_v27 }
 0x3df   :  { %v904_v30 = vadd.s32 %v903_v28, %v901_v29 }
 0x3e1   :  { %vm905_vm10 = vcmp.eq.s32.totalorder %v1570_v26, %v904_v30 }
 0x3e2   :  { %v1064_v32 = vsel %vm905_vm10, 1.0, %v1298_v34  ;;  %v953_v33 = vpop.xlane.xlu0 %952 }
 0x3e3   :  { %v908_v0 = vsel %vm48_vm0, %v1064_v32, 0.0  ;;  %v954_v31 = vrot.slane %v953_v33, 4 }
 0x3e4   :  { %v909_v35 = vrot.slane %v908_v0, 4 }
 0x3e5   :  { %v955_v36 = vadd.f32 %v954_v31, %v953_v33 }
 0x3e6   :  { %v910_v38 = vadd.f32 %v909_v35, %v908_v0 }
 0x3e7   :  { %v956_v39 = vrot.slane %v955_v36, 2 }
 0x3e8   :  { %v911_v40 = vrot.slane %v910_v38, 2 }
 0x3e9   :  { %v957_v41 = vadd.f32 %v956_v39, %v955_v36 }
 0x3ea   :  { %v912_v42 = vadd.f32 %v911_v40, %v910_v38 }
 0x3eb   :  { %v958_v43 = vrot.slane %v957_v41, 1 }
 0x3ec   :  { %v913_v44 = vrot.slane %v912_v42, 1 }
 0x3ed   :  { %v959_v45 = vadd.f32 %v958_v43, %v957_v41 }
 0x3ee   :  { %v914_v46 = vadd.f32 %v913_v44, %v912_v42 }
 0x3ef   :  { %1156 = vpush %v959_v45 }
 0x3f0   :  { %915 = vst.msk [vmem:[#allocation7] sm:$0x1] %vm824_vm2, %v914_v46 }
 0x3f1   :  { %1261 = shalt.err (!%p1258_p10)
}
 0x3f2   :  { %984 = dma.vmem_to_hbm [thread:$0]  %s982_s29, 16, %s1640_s8, [#allocation8]   ;;  %vm963_vm11 = vcmask 0  }
 0x3f3   :  { %s1300_s11 = smov [#allocation6]  }
 0x3f4   :  { %s971_s0 = sshll.u32 %s1300_s11, 4  ;;  %s972_s0 = int_to_ptr.vmem [resolvable:$true] %s971_s0 }
 0x3f5   :  { %s1270_s13 = scalar_lea.vmem %s972_s0, 16  ;;  %s1274_s14 = scalar_lea.vmem %s972_s0, 32 }
 0x3f6   :  { %p1271_p11 = scmp.ne.s32.totalorder %s972_s0, %s1270_s13  ;;  %p1275_p12 = scmp.lt.s32.totalorder %s972_s0, %s972_s0 }
 0x3f7   :  { %p1276_p13 = scmp.lt.s32.totalorder %s1274_s14, %s1270_s13 }
 0x3f9   :  { %p1277_p0 = por %p1276_p13, %p1275_p12 }
 0x3fb   :  { %p1278_p1 = pnand %p1277_p0, %p1271_p11 }
 0x420   :  { %s1157_s12 = spop %1156 }
 0x421   :  { %v961_v26 = vstv %s1157_s12 }
 0x422   :  { %v962_v34 = vmul.f32 0.5, %v961_v26 }
 0x424   :  { %964 = vst.msk [vmem:[#allocation6] sm:$0x1] %vm963_vm11, %v962_v34 }
 0x425   :  { %1281 = shalt.err (!%p1278_p1)
}
 0x426   :  { %974 = dma.vmem_to_hbm [thread:$0]  %s972_s0, 16, %s1639_s7, [#allocation4]  }
 0x427   :  { %1292 = dma.done.wait [#allocation4], 16  }
 0x428   :  { %1293 = vsyncadd [#allocation4], 4294967280 }
 0x429   :  { %1294 = dma.done.wait [#allocation8], 16  }
 0x42a   :  { %1295 = vsyncadd [#allocation8], 4294967280 }
 0x42b   :  { %991 = vsyncpa [#allocation4], 1 }
 0x42c   :  { %992 = vsyncpa [#allocation8], 1 }
 0x42d   :  { %993 = vsyncpa [#allocation5], 1 }

</bundles_post_ra>
